<compile_context>
chip_gen: v6e
topology: v6e:2x2x1
jax: 0.10.0
libtpu: 0.0.40
codegen_flags: <defaults>
</compile_context>

<pallas_src>
import jax
import jax.numpy as jnp
from jax.experimental import pallas as pl
from jax.experimental.pallas import tpu as pltpu

LANE = 128


def _round_up(n, m):
    return ((n + m - 1) // m) * m


# ---------------------------------------------------------------------------
# Kernel: L fused BasicBlocks (eval mode) for one batch tile.
# ---------------------------------------------------------------------------
def basic_block_stack_kernel(x_ref, w_ref, b_ref, a_ref, o_ref):
    """Fused eval-mode BasicBlock stack.

    x_ref : (TB, Hp)      f32/bf16 VMEM  zero-padded activations
    w_ref : (2L, Hp, Hp)  bf16     VMEM  per-layer weights (pre-transposed,
                                          BN scale folded in), grid-constant
    b_ref : (2L, Hp)      f32      VMEM  folded biases (lin_b*bn_scale + shift)
    a_ref : (2L,)         f32      SMEM  PReLU slopes
    o_ref : (TB, Hp)      f32/bf16 VMEM
    """
    h = x_ref[...].astype(jnp.float32)
    n_layers = w_ref.shape[0]                 # static == 2 * n_blocks
    for layer0 in range(0, n_layers, 2):      # statically unrolled over blocks
        x_in = h
        for j in (0, 1):                      # Linear + folded BN + PReLU (+Dropout=id)
            idx = layer0 + j
            y = jnp.dot(h.astype(jnp.bfloat16), w_ref[idx],
                        preferred_element_type=jnp.float32)
            y = y + b_ref[idx][None, :]
            h = jnp.where(y > 0, y, a_ref[idx] * y)
        h = h + x_in                          # residual connection
    o_ref[...] = h.astype(o_ref.dtype)


# ---------------------------------------------------------------------------
# Wrappers
# ---------------------------------------------------------------------------
def basic_block_stack(x, params, *, tb=None, out_dtype=jnp.float32):
    """x: (B, H) f32 or bf16. params: output of prepare_stack_params()."""
    B, H = x.shape
    Hp = params["w"].shape[-1]
    assert H <= Hp

    if tb is None:
        # Whole batch in one grid step when small; 512-row tiles (multiple of
        # 128) otherwise — larger tiles amortise the ~0.35 µs per-step overhead.
        tb = min(_round_up(B, 16), 512)
    Bp = _round_up(B, tb)

    if (Bp, Hp) != (B, H):
        x = jnp.pad(x, ((0, Bp - B), (0, Hp - H)))

    grid = (Bp // tb,)

    # Explicit VMEM budget: resident weights/biases (worst case double-buffered)
    # + double-buffered x/out tiles + headroom.  The default scoped limits
    # (16/32 MiB) would bite long before physical VMEM once Hp grows.
    w_bytes = params["w"].size * params["w"].dtype.itemsize
    b_bytes = params["b"].size * params["b"].dtype.itemsize
    act_bytes = 2 * 2 * tb * Hp * 4
    vmem_limit = int(min(100 << 20,
                         max(2 * (w_bytes + b_bytes) + act_bytes + (4 << 20),
                             32 << 20)))

    def resident_spec(shape, single_buffer):
        # Operand whose index_map is constant across the grid: stays resident.
        n = len(shape)

        def index_map(i):
            return (0,) * n

        if single_buffer:
            # No need to double-buffer data that never changes across steps.
            return pl.BlockSpec(shape, index_map, pipeline_mode=pl.Buffered(1))
        return pl.BlockSpec(shape, index_map)

    def run(single_buffer_weights):
        return pl.pallas_call(
            basic_block_stack_kernel,
            out_shape=jax.ShapeDtypeStruct((Bp, Hp), out_dtype),
            grid=grid,
            in_specs=[
                pl.BlockSpec((tb, Hp), lambda i: (i, 0)),             # x tile
                resident_spec(params["w"].shape, single_buffer_weights),
                resident_spec(params["b"].shape, single_buffer_weights),
                pl.BlockSpec(memory_space=pltpu.MemorySpace.SMEM),    # PReLU slopes
            ],
            out_specs=pl.BlockSpec((tb, Hp), lambda i: (i, 0)),
            compiler_params=pltpu.CompilerParams(
                dimension_semantics=("parallel",),
                vmem_limit_bytes=vmem_limit),
        )(x, params["w"], params["b"], params["a"])

    try:
        out = run(True)      # single-buffered resident weights
    except Exception:        # pl.Buffered(1) unsupported on this jax version
        out = run(False)     # fall back to default double buffering

    return out[:B, :H]


def basic_block(x, params, *, tb=None, out_dtype=jnp.float32):
    """Single BasicBlock forward; params from prepare_params()."""
    return basic_block_stack(x, params, tb=tb, out_dtype=out_dtype)


# ---------------------------------------------------------------------------
# Parameter construction (PyTorch defaults) and folding / padding / stacking.
# ---------------------------------------------------------------------------
def init_torch_params(key, hidden_dim, output_dim):
    """Raw parameters matching nn.Linear / nn.BatchNorm1d / nn.PReLU defaults."""
    k1, k2 = jax.random.split(key)

    def linear_init(k, fan_in, fan_out):
        bound = 1.0 / jnp.sqrt(jnp.float32(fan_in))
        kw, kb = jax.random.split(k)
        # stored pre-transposed: [in_features, out_features]
        w = jax.random.uniform(kw, (fan_in, fan_out), jnp.float32, -bound, bound)
        b = jax.random.uniform(kb, (fan_out,), jnp.float32, -bound, bound)
        return w, b

    w1, b1 = linear_init(k1, hidden_dim, hidden_dim)
    w2, b2 = linear_init(k2, hidden_dim, output_dim)

    def bn(d):
        return dict(gamma=jnp.ones((d,), jnp.float32),
                    beta=jnp.zeros((d,), jnp.float32),
                    mean=jnp.zeros((d,), jnp.float32),
                    var=jnp.ones((d,), jnp.float32),
                    eps=1e-5)

    return dict(w1=w1, b1=b1, bn1=bn(hidden_dim), a1=jnp.float32(0.25),
                w2=w2, b2=b2, bn2=bn(output_dim), a2=jnp.float32(0.25))


def _fold(w, b, bn):
    """Fold eval-mode BatchNorm1d into the preceding Linear."""
    scale = bn["gamma"] / jnp.sqrt(bn["var"] + bn["eps"])
    return w * scale[None, :], (b - bn["mean"]) * scale + bn["beta"]


def prepare_stack_params(raw_blocks):
    """Fold BN into the linears, pad to 128-lane width, cast to bf16, stack."""
    H = int(raw_blocks[0]["w1"].shape[0])
    Hp = max(LANE, _round_up(H, LANE))

    ws, bs, slopes = [], [], []
    for raw in raw_blocks:
        h_in, h_hid = raw["w1"].shape
        d_out = raw["w2"].shape[1]
        # Residual `block(x) + x` requires output_dim == hidden_dim (PyTorch would
        # error at runtime otherwise); fail loudly instead of silently padding.
        assert h_in == h_hid == d_out == H, \
            "BasicBlock residual requires input_dim == hidden_dim == output_dim"

        w1, b1 = _fold(raw["w1"], raw["b1"], raw["bn1"])
        w2, b2 = _fold(raw["w2"], raw["b2"], raw["bn2"])
        pad2 = lambda w: jnp.pad(w, ((0, Hp - w.shape[0]), (0, Hp - w.shape[1])))
        pad1 = lambda b: jnp.pad(b, (0, Hp - b.shape[0]))
        ws += [pad2(w1), pad2(w2)]
        bs += [pad1(b1), pad1(b2)]
        slopes += [raw["a1"], raw["a2"]]

    return dict(
        w=jnp.stack(ws).astype(jnp.bfloat16),      # (2L, Hp, Hp)
        b=jnp.stack(bs).astype(jnp.float32),       # (2L, Hp)
        a=jnp.stack(slopes).astype(jnp.float32),   # (2L,)
    )


def prepare_params(raw):
    """Single-block convenience wrapper (L = 1)."""
    return prepare_stack_params([raw])


# ---------------------------------------------------------------------------
# Pure-JAX references
# ---------------------------------------------------------------------------
def reference_block(x, raw, *, match_bf16=True):
    w1, b1 = _fold(raw["w1"], raw["b1"], raw["bn1"])
    w2, b2 = _fold(raw["w2"], raw["b2"], raw["bn2"])
    cast = (lambda t: t.astype(jnp.bfloat16)) if match_bf16 else (lambda t: t)
    h = jnp.dot(cast(x), cast(w1), preferred_element_type=jnp.float32) + b1
    h = jnp.where(h > 0, h, raw["a1"] * h)
    h = jnp.dot(cast(h), cast(w2), preferred_element_type=jnp.float32) + b2
    h = jnp.where(h > 0, h, raw["a2"] * h)
    return h + x


def reference_stack(x, raw_blocks, *, match_bf16=True):
    for raw in raw_blocks:
        x = reference_block(x, raw, match_bf16=match_bf16)
    return x


if __name__ == "__main__":
    # Residual requires output_dim == hidden_dim (as in the PyTorch module's usage).
    B, HIDDEN_DIM, OUTPUT_DIM, N_BLOCKS = 16, 32, 32, 3
    key = jax.random.PRNGKey(0)
    kx, kp = jax.random.split(key)
    x = jax.random.normal(kx, (B, HIDDEN_DIM), jnp.float32)

    raw_blocks = [init_torch_params(k, HIDDEN_DIM, OUTPUT_DIM)
                  for k in jax.random.split(kp, N_BLOCKS)]

    # --- single BasicBlock --------------------------------------------------
    params1 = prepare_params(raw_blocks[0])
    out1 = jax.block_until_ready(basic_block(x, params1))
    assert out1.shape == (B, OUTPUT_DIM)
    assert jnp.allclose(out1, reference_block(x, raw_blocks[0], match_bf16=True),
                        atol=2e-3, rtol=2e-3), "single block: mismatch vs bf16 ref"
    assert jnp.allclose(out1, reference_block(x, raw_blocks[0], match_bf16=False),
                        atol=5e-2, rtol=5e-2), "single block: mismatch vs f32 ref"

    # --- fused stack of 3 BasicBlocks in ONE pallas_call ---------------------
    params = prepare_stack_params(raw_blocks)
    out = jax.block_until_ready(basic_block_stack(x, params))
    assert out.shape == (B, OUTPUT_DIM)
    ref16 = reference_stack(x, raw_blocks, match_bf16=True)
    ref32 = reference_stack(x, raw_blocks, match_bf16=False)
    assert jnp.allclose(out, ref16, atol=5e-3, rtol=5e-3), "stack: mismatch vs bf16 ref"
    assert jnp.allclose(out, ref32, atol=1.5e-1, rtol=1e-1), "stack: mismatch vs f32 ref"

    # --- bf16 output variant (halves activation writeback bytes) -------------
    out_bf16 = jax.block_until_ready(
        basic_block_stack(x, params, out_dtype=jnp.bfloat16))
    assert out_bf16.dtype == jnp.bfloat16
    assert jnp.allclose(out_bf16.astype(jnp.float32), ref16,
                        atol=5e-2, rtol=5e-2), "bf16 output: mismatch vs bf16 ref"

    print("KERNEL_OK")
</pallas_src>

<mosaic_0001>
module attributes {stable_mosaic.version = 11 : i64} {
  func.func @basic_block_stack_kernel(%arg0: i32, %arg1: memref<16x128xf32, #tpu.memory_space<vmem>>, %arg2: memref<2x128x128xbf16, #tpu.memory_space<vmem>>, %arg3: memref<2x128xf32, #tpu.memory_space<vmem>>, %arg4: memref<2xf32, #tpu.memory_space<smem>>, %arg5: memref<16x128xf32, #tpu.memory_space<vmem>>) attributes {dimension_semantics = [#tpu.dimension_semantics<parallel>], iteration_bounds = array<i64: 1>, scalar_prefetch = 0 : i64, scratch_operands = 0 : i64, tpu.core_type = #tpu.core_type<tc>, window_params = [{transform_indices = @transform_0, window_bounds = array<i64: 16, 128>}, {pipeline_mode = #tpu.pipeline_mode<synchronous>, transform_indices = @transform_1, window_bounds = array<i64: 2, 128, 128>}, {pipeline_mode = #tpu.pipeline_mode<synchronous>, transform_indices = @transform_2, window_bounds = array<i64: 2, 128>}, {transform_indices = @transform_3, window_bounds = array<i64: 2>}, {transform_indices = @transform_4, window_bounds = array<i64: 16, 128>}]} {
    %c0 = arith.constant 0 : index
    %c0_0 = arith.constant 0 : index
    %0 = vector.load %arg1[%c0, %c0_0] : memref<16x128xf32, #tpu.memory_space<vmem>>, vector<16x128xf32>
    %1 = arith.truncf %0 : vector<16x128xf32> to vector<16x128xbf16>
    %c0_1 = arith.constant 0 : index
    %c0_2 = arith.constant 0 : index
    %c0_3 = arith.constant 0 : index
    %2 = vector.load %arg2[%c0_1, %c0_2, %c0_3] : memref<2x128x128xbf16, #tpu.memory_space<vmem>>, vector<1x128x128xbf16>
    %3 = vector.shape_cast %2 : vector<1x128x128xbf16> to vector<128x128xbf16>
    %cst = arith.constant dense<0.000000e+00> : vector<16x128xf32>
    %4 = tpu.matmul %1, %3, %cst {dimension_numbers = #tpu.dot_dimension_numbers<[1], [0], [0], [1], [0, 0, 1, 1], [], []>} : vector<16x128xbf16>, vector<128x128xbf16>, vector<16x128xf32> -> vector<16x128xf32>
    %c0_4 = arith.constant 0 : index
    %c0_5 = arith.constant 0 : index
    %5 = vector.load %arg3[%c0_4, %c0_5] : memref<2x128xf32, #tpu.memory_space<vmem>>, vector<1x128xf32>
    %6 = vector.shape_cast %5 : vector<1x128xf32> to vector<128xf32>
    %7 = vector.shape_cast %6 : vector<128xf32> to vector<1x128xf32>
    %8 = vector.broadcast %7 : vector<1x128xf32> to vector<16x128xf32>
    %9 = arith.addf %4, %8 : vector<16x128xf32>
    %cst_6 = arith.constant 0.000000e+00 : f32
    %10 = vector.broadcast %cst_6 : f32 to vector<16x128xf32>
    %11 = arith.cmpf ogt, %9, %10 : vector<16x128xf32>
    %c0_7 = arith.constant 0 : index
    %12 = memref.load %arg4[%c0_7] : memref<2xf32, #tpu.memory_space<smem>>
    %13 = vector.broadcast %12 : f32 to vector<16x128xf32>
    %14 = arith.mulf %13, %9 : vector<16x128xf32>
    %15 = arith.select %11, %9, %14 : vector<16x128xi1>, vector<16x128xf32>
    %16 = arith.truncf %15 : vector<16x128xf32> to vector<16x128xbf16>
    %c1 = arith.constant 1 : index
    %c0_8 = arith.constant 0 : index
    %c0_9 = arith.constant 0 : index
    %17 = vector.load %arg2[%c1, %c0_8, %c0_9] : memref<2x128x128xbf16, #tpu.memory_space<vmem>>, vector<1x128x128xbf16>
    %18 = vector.shape_cast %17 : vector<1x128x128xbf16> to vector<128x128xbf16>
    %cst_10 = arith.constant dense<0.000000e+00> : vector<16x128xf32>
    %19 = tpu.matmul %16, %18, %cst_10 {dimension_numbers = #tpu.dot_dimension_numbers<[1], [0], [0], [1], [0, 0, 1, 1], [], []>} : vector<16x128xbf16>, vector<128x128xbf16>, vector<16x128xf32> -> vector<16x128xf32>
    %c1_11 = arith.constant 1 : index
    %c0_12 = arith.constant 0 : index
    %20 = vector.load %arg3[%c1_11, %c0_12] : memref<2x128xf32, #tpu.memory_space<vmem>>, vector<1x128xf32>
    %21 = vector.shape_cast %20 : vector<1x128xf32> to vector<128xf32>
    %22 = vector.shape_cast %21 : vector<128xf32> to vector<1x128xf32>
    %23 = vector.broadcast %22 : vector<1x128xf32> to vector<16x128xf32>
    %24 = arith.addf %19, %23 : vector<16x128xf32>
    %cst_13 = arith.constant 0.000000e+00 : f32
    %25 = vector.broadcast %cst_13 : f32 to vector<16x128xf32>
    %26 = arith.cmpf ogt, %24, %25 : vector<16x128xf32>
    %c1_14 = arith.constant 1 : index
    %27 = memref.load %arg4[%c1_14] : memref<2xf32, #tpu.memory_space<smem>>
    %28 = vector.broadcast %27 : f32 to vector<16x128xf32>
    %29 = arith.mulf %28, %24 : vector<16x128xf32>
    %30 = arith.select %26, %24, %29 : vector<16x128xi1>, vector<16x128xf32>
    %31 = arith.addf %30, %0 : vector<16x128xf32>
    %c0_15 = arith.constant 0 : index
    %c0_16 = arith.constant 0 : index
    %32 = vector.load %arg5[%c0_15, %c0_16] : memref<16x128xf32, #tpu.memory_space<vmem>>, vector<16x128xf32>
    tpu.vector_store %arg5[%c0_15, %c0_16], %31 {strides = array<i32>} : memref<16x128xf32, #tpu.memory_space<vmem>>, vector<16x128xf32>,
    return
  }
  func.func @transform_0(%arg0: i32) -> (i32, i32) {
    %c0_i32 = arith.constant 0 : i32
    %c0_i32_0 = arith.constant 0 : i32
    return %arg0, %c0_i32 : i32, i32
  }
  func.func @transform_1(%arg0: i32) -> (i32, i32, i32) {
    %c0_i32 = arith.constant 0 : i32
    %c0_i32_0 = arith.constant 0 : i32
    %c0_i32_1 = arith.constant 0 : i32
    %c0_i32_2 = arith.constant 0 : i32
    return %c0_i32, %c0_i32_0, %c0_i32_1 : i32, i32, i32
  }
  func.func @transform_2(%arg0: i32) -> (i32, i32) {
    %c0_i32 = arith.constant 0 : i32
    %c0_i32_0 = arith.constant 0 : i32
    %c0_i32_1 = arith.constant 0 : i32
    return %c0_i32, %c0_i32_0 : i32, i32
  }
  func.func @transform_3(%arg0: i32) -> i32 {
    %c0_i32 = arith.constant 0 : i32
    %c0_i32_0 = arith.constant 0 : i32
    return %c0_i32 : i32
  }
  func.func @transform_4(%arg0: i32) -> (i32, i32) {
    %c0_i32 = arith.constant 0 : i32
    %c0_i32_0 = arith.constant 0 : i32
    return %arg0, %c0_i32 : i32, i32
  }
}

module attributes {stable_mosaic.version = 11 : i64} {
  func.func @basic_block_stack_kernel(%arg0: i32, %arg1: memref<16x128xf32, #tpu.memory_space<vmem>>, %arg2: memref<2x128x128xbf16, #tpu.memory_space<vmem>>, %arg3: memref<2x128xf32, #tpu.memory_space<vmem>>, %arg4: memref<2xf32, #tpu.memory_space<smem>>, %arg5: memref<16x128xf32, #tpu.memory_space<vmem>>) attributes {dimension_semantics = [#tpu.dimension_semantics<parallel>], iteration_bounds = array<i64: 1>, scalar_prefetch = 0 : i64, scratch_operands = 0 : i64, tpu.core_type = #tpu.core_type<tc>, window_params = [{transform_indices = @transform_0, window_bounds = array<i64: 16, 128>}, {pipeline_mode = #tpu.pipeline_mode<synchronous>, transform_indices = @transform_1, window_bounds = array<i64: 2, 128, 128>}, {pipeline_mode = #tpu.pipeline_mode<synchronous>, transform_indices = @transform_2, window_bounds = array<i64: 2, 128>}, {transform_indices = @transform_3, window_bounds = array<i64: 2>}, {transform_indices = @transform_4, window_bounds = array<i64: 16, 128>}]} {
    %c0 = arith.constant 0 : index
    %c0_0 = arith.constant 0 : index
    %0 = vector.load %arg1[%c0, %c0_0] : memref<16x128xf32, #tpu.memory_space<vmem>>, vector<16x128xf32>
    %1 = arith.truncf %0 : vector<16x128xf32> to vector<16x128xbf16>
    %c0_1 = arith.constant 0 : index
    %c0_2 = arith.constant 0 : index
    %c0_3 = arith.constant 0 : index
    %2 = vector.load %arg2[%c0_1, %c0_2, %c0_3] : memref<2x128x128xbf16, #tpu.memory_space<vmem>>, vector<1x128x128xbf16>
    %3 = vector.shape_cast %2 : vector<1x128x128xbf16> to vector<128x128xbf16>
    %cst = arith.constant dense<0.000000e+00> : vector<16x128xf32>
    %4 = tpu.matmul %1, %3, %cst {dimension_numbers = #tpu.dot_dimension_numbers<[1], [0], [0], [1], [0, 0, 1, 1], [], []>} : vector<16x128xbf16>, vector<128x128xbf16>, vector<16x128xf32> -> vector<16x128xf32>
    %c0_4 = arith.constant 0 : index
    %c0_5 = arith.constant 0 : index
    %5 = vector.load %arg3[%c0_4, %c0_5] : memref<2x128xf32, #tpu.memory_space<vmem>>, vector<1x128xf32>
    %6 = vector.shape_cast %5 : vector<1x128xf32> to vector<128xf32>
    %7 = vector.shape_cast %6 : vector<128xf32> to vector<1x128xf32>
    %8 = vector.broadcast %7 : vector<1x128xf32> to vector<16x128xf32>
    %9 = arith.addf %4, %8 : vector<16x128xf32>
    %cst_6 = arith.constant 0.000000e+00 : f32
    %10 = vector.broadcast %cst_6 : f32 to vector<16x128xf32>
    %11 = arith.cmpf ogt, %9, %10 : vector<16x128xf32>
    %c0_7 = arith.constant 0 : index
    %12 = memref.load %arg4[%c0_7] : memref<2xf32, #tpu.memory_space<smem>>
    %13 = vector.broadcast %12 : f32 to vector<16x128xf32>
    %14 = arith.mulf %13, %9 : vector<16x128xf32>
    %15 = arith.select %11, %9, %14 : vector<16x128xi1>, vector<16x128xf32>
    %16 = arith.truncf %15 : vector<16x128xf32> to vector<16x128xbf16>
    %c1 = arith.constant 1 : index
    %c0_8 = arith.constant 0 : index
    %c0_9 = arith.constant 0 : index
    %17 = vector.load %arg2[%c1, %c0_8, %c0_9] : memref<2x128x128xbf16, #tpu.memory_space<vmem>>, vector<1x128x128xbf16>
    %18 = vector.shape_cast %17 : vector<1x128x128xbf16> to vector<128x128xbf16>
    %cst_10 = arith.constant dense<0.000000e+00> : vector<16x128xf32>
    %19 = tpu.matmul %16, %18, %cst_10 {dimension_numbers = #tpu.dot_dimension_numbers<[1], [0], [0], [1], [0, 0, 1, 1], [], []>} : vector<16x128xbf16>, vector<128x128xbf16>, vector<16x128xf32> -> vector<16x128xf32>
    %c1_11 = arith.constant 1 : index
    %c0_12 = arith.constant 0 : index
    %20 = vector.load %arg3[%c1_11, %c0_12] : memref<2x128xf32, #tpu.memory_space<vmem>>, vector<1x128xf32>
    %21 = vector.shape_cast %20 : vector<1x128xf32> to vector<128xf32>
    %22 = vector.shape_cast %21 : vector<128xf32> to vector<1x128xf32>
    %23 = vector.broadcast %22 : vector<1x128xf32> to vector<16x128xf32>
    %24 = arith.addf %19, %23 : vector<16x128xf32>
    %cst_13 = arith.constant 0.000000e+00 : f32
    %25 = vector.broadcast %cst_13 : f32 to vector<16x128xf32>
    %26 = arith.cmpf ogt, %24, %25 : vector<16x128xf32>
    %c1_14 = arith.constant 1 : index
    %27 = memref.load %arg4[%c1_14] : memref<2xf32, #tpu.memory_space<smem>>
    %28 = vector.broadcast %27 : f32 to vector<16x128xf32>
    %29 = arith.mulf %28, %24 : vector<16x128xf32>
    %30 = arith.select %26, %24, %29 : vector<16x128xi1>, vector<16x128xf32>
    %31 = arith.addf %30, %0 : vector<16x128xf32>
    %c0_15 = arith.constant 0 : index
    %c0_16 = arith.constant 0 : index
    %32 = vector.load %arg5[%c0_15, %c0_16] : memref<16x128xf32, #tpu.memory_space<vmem>>, vector<16x128xf32>
    tpu.vector_store %arg5[%c0_15, %c0_16], %31 {strides = array<i32>} : memref<16x128xf32, #tpu.memory_space<vmem>>, vector<16x128xf32>,
    return
  }
  func.func @transform_0(%arg0: i32) -> (i32, i32) {
    %c0_i32 = arith.constant 0 : i32
    %c0_i32_0 = arith.constant 0 : i32
    return %arg0, %c0_i32 : i32, i32
  }
  func.func @transform_1(%arg0: i32) -> (i32, i32, i32) {
    %c0_i32 = arith.constant 0 : i32
    %c0_i32_0 = arith.constant 0 : i32
    %c0_i32_1 = arith.constant 0 : i32
    %c0_i32_2 = arith.constant 0 : i32
    return %c0_i32, %c0_i32_0, %c0_i32_1 : i32, i32, i32
  }
  func.func @transform_2(%arg0: i32) -> (i32, i32) {
    %c0_i32 = arith.constant 0 : i32
    %c0_i32_0 = arith.constant 0 : i32
    %c0_i32_1 = arith.constant 0 : i32
    return %c0_i32, %c0_i32_0 : i32, i32
  }
  func.func @transform_3(%arg0: i32) -> i32 {
    %c0_i32 = arith.constant 0 : i32
    %c0_i32_0 = arith.constant 0 : i32
    return %c0_i32 : i32
  }
  func.func @transform_4(%arg0: i32) -> (i32, i32) {
    %c0_i32 = arith.constant 0 : i32
    %c0_i32_0 = arith.constant 0 : i32
    return %arg0, %c0_i32 : i32, i32
  }
}

</mosaic_0001>

<bundles_post_ra>
// kernel: tpu_custom_call.1
= control target key start
LH: loop header
LB: loop body
LE: loop exit
PB: predicated region body
PF: predicated region fallthrough
CT: control target
= control target key end

     0   :  { %9 = vsyncpa [#allocation3], 0  ;;  %s566_s0 = inlined_call_operand.hbm [shape: f32[16,128], index: 0, kind: input, shape index: {}]   ;;  %s567_s1 = inlined_call_operand.hbm [shape: bf16[2,128,128], index: 1, kind: input, shape index: {}]   ;;  %s568_s2 = inlined_call_operand.vmem [shape: f32[2,128], index: 2, kind: input, shape index: {}]   ;;  %s569_s3 = inlined_call_operand.vmem [shape: f32[2], index: 3, kind: input, shape index: {}]   ;;  %s570_s4 = inlined_call_operand.hbm [shape: f32[16,128], index: 4, kind: output, shape index: {}]  }
   0x1   :  { %10 = vsyncpa [#allocation7], 0 }
   0x2   :  { %11 = vsyncpa [#allocation5], 0 }
   0x3   :  { %12 = vsyncpa [#allocation4], 0  ;;  %s507_s15 = smov [#allocation2]  }
   0x4   :  { %s18_s16 = sshll.u32 %s507_s15, 4  ;;  %s19_s16 = int_to_ptr.vmem [resolvable:$true] %s18_s16 }
   0x5   :  { %s435_s17 = scalar_lea.vmem %s19_s16, 256  ;;  %p440_p1 = scmp.lt.s32.totalorder %s19_s16, %s19_s16 }
   0x6   :  { %p436_p0 = scmp.ne.s32.totalorder %s19_s16, %s435_s17  ;;  %p441_p2 = scmp.lt.s32.totalorder %s435_s17, %s435_s17 }
   0x8   :  { %p442_p3 = por %p441_p2, %p440_p1 }
   0xa   :  { %p443_p4 = pnand %p442_p3, %p436_p0 }
   0xc   :  { %446 = shalt.err (!%p443_p4)
}
   0xd   :  { %s508_s18 = smov 128   ;;  %s509_s19 = smov 8  }
   0xe   :  { %24 = dma.hbm_to_vmem [thread:$0]  %s566_s0, 256, %s19_s16, [#allocation3], %s508_s18, %s508_s18, %s509_s19  }
   0xf   :  { %s510_s22 = smov [#allocation6]  }
  0x10   :  { %s30_s23 = sshll.u32 %s510_s22, 4  ;;  %s31_s23 = int_to_ptr.vmem [resolvable:$true] %s30_s23 }
  0x11   :  { %s455_s24 = scalar_lea.vmem %s31_s23, 2048  ;;  %p460_p6 = scmp.lt.s32.totalorder %s31_s23, %s31_s23 }
  0x12   :  { %p456_p5 = scmp.ne.s32.totalorder %s31_s23, %s455_s24  ;;  %p461_p7 = scmp.lt.s32.totalorder %s455_s24, %s455_s24 }
  0x14   :  { %p462_p8 = por %p461_p7, %p460_p6 }
  0x16   :  { %p463_p9 = pnand %p462_p8, %p456_p5 }
  0x18   :  { %466 = shalt.err (!%p463_p9)
}
  0x19   :  { %s511_s25 = smov 64   ;;  %s512_s26 = smov 4  }
  0x1a   :  { %36 = dma.hbm_to_vmem [thread:$0]  %s567_s1, 2048, %s31_s23, [#allocation7], %s511_s25, %s511_s25, %s512_s26  }
  0x1b   :  { %s45_s0 = sshll.u32 %s569_s3, 4  ;;  %s46_s0 = int_to_ptr.vmem [resolvable:$true] %s45_s0 }
  0x1c   :  { %s467_s5 = scalar_lea.vmem %s46_s0, 16  ;;  %p472_p11 = scmp.lt.s32.totalorder %s46_s0, %s46_s0 }
  0x1d   :  { %p468_p10 = scmp.ne.s32.totalorder %s46_s0, %s467_s5  ;;  %p473_p12 = scmp.lt.s32.totalorder %s467_s5, %s467_s5 }
  0x1f   :  { %p474_p13 = por %p473_p12, %p472_p11 }
  0x21   :  { %p475_p0 = pnand %p474_p13, %p468_p10 }
  0x23   :  { %478 = shalt.err (!%p475_p0)
}
  0x24   :  { %s513_s6 = smov [#allocation8]  }
  0x25   :  { %48 = dma.vmem_to_smem %s46_s0, 16, %s513_s6, [#allocation5]  }
  0x26   :  { %499 = dma.done.wait [#allocation3], 256  }
  0x27   :  { %500 = vsyncadd [#allocation3], 4294967040 }
  0x28   :  { %501 = dma.done.wait [#allocation7], 2048  }
  0x29   :  { %502 = vsyncadd [#allocation7], 4294965248 }
  0x2a   :  { %503 = dma.done.wait [#allocation5], 16  }
  0x2b   :  { %504 = vsyncadd [#allocation5], 4294967280 }
  0x2c   :  { %58 = sfence }
  0x2d   :  { %v411_v0 = vld [vmem:[#allocation6 + $0x38] sm:$0xff]   ;;  %v514_v1 = vmov 0.0   ;;  %v412_v2 = vld [vmem:[#allocation6 + $0x30] sm:$0xff]   ;;  %vm515_vm0 = vmmov 0   ;;  %v413_v3 = vld [vmem:[#allocation6 + $0x28] sm:$0xff]   ;;  %s175_s1 = sld [smem:[#allocation8]] }
  0x2e   :  { %361 = vmatprep.subr.bf16.mxu0 %v514_v1  ;;  %381 = vmatprep.subr.bf16.mxu1 %v514_v1  ;;  %v419_v4 = vld [vmem:[#allocation6 + $0x78] sm:$0xff]   ;;  %v414_v5 = vld [vmem:[#allocation6 + $0x20] sm:$0xff]   ;;  %v420_v6 = vld [vmem:[#allocation6 + $0x70] sm:$0xff]   ;;  %s342_s8 = sld [smem:[#allocation8 + $0x1]]  ;;  %s516_s11 = smov [#allocation9]  }
  0x2f   :  { %362 = vmatpush3.bf16.msra.mxu0 %v411_v0  ;;  %377 = vmatprep.mubr.msk.bf16.mxu0 %vm515_vm0, %v514_v1  ;;  %v415_v7 = vld [vmem:[#allocation6 + $0x18] sm:$0xff]   ;;  %v421_v8 = vld [vmem:[#allocation6 + $0x68] sm:$0xff]   ;;  %v416_v9 = vld [vmem:[#allocation6 + $0x10] sm:$0xff]   ;;  %s310_s12 = sshll.u32 %s516_s11, 4  ;;  %s311_s12 = int_to_ptr.vmem [resolvable:$true] %s310_s12 }
  0x30   :  { %363 = vmatprep.subr.bf16.mxu0 %v514_v1  ;;  %397 = vmatprep.mubr.msk.bf16.mxu1 %vm515_vm0, %v514_v1  ;;  %v422_v10 = vld [vmem:[#allocation6 + $0x60] sm:$0xff]   ;;  %v417_v11 = vld [vmem:[#allocation6 + $0x8] sm:$0xff]   ;;  %v423_v12 = vld [vmem:[#allocation6 + $0x58] sm:$0xff]   ;;  %p484_p2 = scmp.lt.s32.totalorder %s311_s12, %s311_s12 }
  0x31   :  { %382 = vmatpush3.bf16.msra.mxu1 %v419_v4  ;;  %v418_v13 = vld [vmem:[#allocation6] sm:$0xff]   ;;  %v60_v14 = vld [vmem:[#allocation2] sm:$0xff]  ;;  %v61_v15 = vld [vmem:[#allocation2 + $0x8] sm:$0xff] }
  0x32   :  { %383 = vmatprep.subr.bf16.mxu1 %v514_v1  ;;  %v62_v16 = vpack.c.bf16 %v61_v15, %v60_v14  ;;  %v424_v17 = vld [vmem:[#allocation6 + $0x50] sm:$0xff]   ;;  %v425_v18 = vld [vmem:[#allocation6 + $0x48] sm:$0xff]   ;;  %v426_v19 = vld [vmem:[#allocation6 + $0x40] sm:$0xff]  }
  0x33   :  { %364 = vmatpush3.bf16.msra.mxu0 %v412_v2  ;;  %v324_v20 = vld [vmem:[%s568_s2] ss:$0 sm:$0xff]  ;;  %v176_v23 = vstv %s175_s1  ;;  %v333_v33 = vld [vmem:[%s568_s2 + $0x1] ss:$0 sm:$0xff]  ;;  %s479_s2 = scalar_lea.vmem %s311_s12, 256 }
  0x34   :  { %365 = vmatprep.subr.bf16.mxu0 %v514_v1  ;;  %v296_v35 = vstv %s342_s8  ;;  %p480_p1 = scmp.ne.s32.totalorder %s311_s12, %s479_s2  ;;  %p485_p3 = scmp.lt.s32.totalorder %s479_s2, %s479_s2 }
  0x35   :  { %384 = vmatpush3.bf16.msra.mxu1 %v420_v6 }
  0x36   :  { %385 = vmatprep.subr.bf16.mxu1 %v514_v1  ;;  %p486_p4 = por %p485_p3, %p484_p2 }
  0x37   :  { %366 = vmatpush3.bf16.msra.mxu0 %v413_v3 }
  0x38   :  { %367 = vmatprep.subr.bf16.mxu0 %v514_v1  ;;  %p487_p5 = pnand %p486_p4, %p480_p1 }
  0x39   :  { %386 = vmatpush3.bf16.msra.mxu1 %v421_v8 }
  0x3a   :  { %387 = vmatprep.subr.bf16.mxu1 %v514_v1 }
  0x3b   :  { %368 = vmatpush3.bf16.msra.mxu0 %v414_v5 }
  0x3c   :  { %369 = vmatprep.subr.bf16.mxu0 %v514_v1 }
  0x3d   :  { %388 = vmatpush3.bf16.msra.mxu1 %v422_v10 }
  0x3e   :  { %389 = vmatprep.subr.bf16.mxu1 %v514_v1 }
  0x3f   :  { %370 = vmatpush3.bf16.msra.mxu0 %v415_v7 }
  0x40   :  { %371 = vmatprep.subr.bf16.mxu0 %v514_v1 }
  0x41   :  { %390 = vmatpush3.bf16.msra.mxu1 %v423_v12 }
  0x42   :  { %391 = vmatprep.subr.bf16.mxu1 %v514_v1 }
  0x43   :  { %372 = vmatpush3.bf16.msra.mxu0 %v416_v9 }
  0x44   :  { %373 = vmatprep.subr.bf16.mxu0 %v514_v1 }
  0x45   :  { %392 = vmatpush3.bf16.msra.mxu1 %v424_v17 }
  0x46   :  { %393 = vmatprep.subr.bf16.mxu1 %v514_v1 }
  0x47   :  { %374 = vmatpush3.bf16.msra.mxu0 %v417_v11 }
  0x48   :  { %375 = vmatprep.subr.bf16.mxu0 %v514_v1 }
  0x49   :  { %394 = vmatpush3.bf16.msra.mxu1 %v425_v18 }
  0x4a   :  { %395 = vmatprep.subr.bf16.mxu1 %v514_v1 }
  0x4b   :  { %376 = vmatpush3.bf16.msra.mxu0 %v418_v13 }
  0x4d   :  { %396 = vmatpush3.bf16.msra.mxu1 %v426_v19 }
  0x4e   :  { %378 = vmatmul.mubr.bf16.vlgmr.msra.gmra.mxu0 %v62_v16 }
 0x10e   :  { %v166_v21 = vpop.f32.mrf.mxu0 }
 0x10f   :  { %v167_v22 = vadd.f32 %v324_v20, %v166_v21 }
 0x110   :  { %v379_v24 = vpop.f32.mrf.mxu0 }
 0x111   :  { %v177_v26 = vmul.f32 %v176_v23, %v167_v22  ;;  %vm173_vm1 = vcmp.gt.f32.partialorder %v167_v22, 0.0 }
 0x112   :  { %v169_v25 = vpop.f32.mrf.mxu0 }
 0x113   :  { %v170_v27 = vadd.f32 %v324_v20, %v169_v25  ;;  %v179_v30 = vsel %vm173_vm1, %v167_v22, %v177_v26 }
 0x114   :  { %v380_v28 = vpop.f32.mrf.mxu0 }
 0x115   :  { %vm174_vm2 = vcmp.gt.f32.partialorder %v170_v27, 0.0  ;;  %v178_v29 = vmul.f32 %v176_v23, %v170_v27 }
 0x117   :  { %v180_v31 = vsel %vm174_vm2, %v170_v27, %v178_v29 }
 0x118   :  { %v181_v32 = vpack.c.bf16 %v180_v31, %v179_v30 }
 0x11a   :  { %398 = vmatmul.mubr.bf16.vlgmr.msra.gmra.mxu1 %v181_v32 }
 0x1da   :  { %v286_v34 = vpop.f32.mrf.mxu1 }
 0x1db   :  { %v287_v36 = vadd.f32 %v333_v33, %v286_v34 }
 0x1dc   :  { %v399_v37 = vpop.f32.mrf.mxu1 }
 0x1dd   :  { %vm293_vm3 = vcmp.gt.f32.partialorder %v287_v36, 0.0  ;;  %v297_v38 = vmul.f32 %v296_v35, %v287_v36 }
 0x1de   :  { %v289_v39 = vpop.f32.mrf.mxu1 }
 0x1df   :  { %v290_v40 = vadd.f32 %v333_v33, %v289_v39  ;;  %v299_v41 = vsel %vm293_vm3, %v287_v36, %v297_v38 }
 0x1e0   :  { %v400_v42 = vpop.f32.mrf.mxu1  ;;  %v301_v43 = vadd.f32 %v299_v41, %v60_v14 }
 0x1e1   :  { %vm294_vm4 = vcmp.gt.f32.partialorder %v290_v40, 0.0  ;;  %v298_v44 = vmul.f32 %v296_v35, %v290_v40 }
 0x1e2   :  { %303 = vst [vmem:[#allocation9] sm:$0xff] %v301_v43 }
 0x1e3   :  { %v300_v45 = vsel %vm294_vm4, %v290_v40, %v298_v44 }
 0x1e4   :  { %v302_v46 = vadd.f32 %v300_v45, %v61_v15 }
 0x1e6   :  { %304 = vst [vmem:[#allocation9 + $0x8] sm:$0xff] %v302_v46 }
 0x1e7   :  { %490 = shalt.err (!%p487_p5)
}
 0x1e8   :  { %316 = dma.vmem_to_hbm [thread:$0]  %s311_s12, 256, %s570_s4, [#allocation4], %s508_s18, %s508_s18, %s509_s19  }
 0x1e9   :  { %505 = dma.done.wait [#allocation4], 256  }
 0x1ea   :  { %506 = vsyncadd [#allocation4], 4294967040 }
 0x1eb   :  { %320 = vsyncpa [#allocation3], 1 }
 0x1ec   :  { %321 = vsyncpa [#allocation7], 1 }
 0x1ed   :  { %322 = vsyncpa [#allocation4], 1 }
 0x1ee   :  { %323 = vsyncpa [#allocation5], 1 }

// kernel: tpu_custom_call.1
= control target key start
LH: loop header
LB: loop body
LE: loop exit
PB: predicated region body
PF: predicated region fallthrough
CT: control target
= control target key end

     0   :  { %9 = vsyncpa [#allocation3], 0  ;;  %s566_s0 = inlined_call_operand.hbm [shape: f32[16,128], index: 0, kind: input, shape index: {}]   ;;  %s567_s1 = inlined_call_operand.hbm [shape: bf16[2,128,128], index: 1, kind: input, shape index: {}]   ;;  %s568_s2 = inlined_call_operand.vmem [shape: f32[2,128], index: 2, kind: input, shape index: {}]   ;;  %s569_s3 = inlined_call_operand.vmem [shape: f32[2], index: 3, kind: input, shape index: {}]   ;;  %s570_s4 = inlined_call_operand.hbm [shape: f32[16,128], index: 4, kind: output, shape index: {}]  }
   0x1   :  { %10 = vsyncpa [#allocation7], 0 }
   0x2   :  { %11 = vsyncpa [#allocation5], 0 }
   0x3   :  { %12 = vsyncpa [#allocation4], 0  ;;  %s507_s15 = smov [#allocation2]  }
   0x4   :  { %s18_s16 = sshll.u32 %s507_s15, 4  ;;  %s19_s16 = int_to_ptr.vmem [resolvable:$true] %s18_s16 }
   0x5   :  { %s435_s17 = scalar_lea.vmem %s19_s16, 256  ;;  %p440_p1 = scmp.lt.s32.totalorder %s19_s16, %s19_s16 }
   0x6   :  { %p436_p0 = scmp.ne.s32.totalorder %s19_s16, %s435_s17  ;;  %p441_p2 = scmp.lt.s32.totalorder %s435_s17, %s435_s17 }
   0x8   :  { %p442_p3 = por %p441_p2, %p440_p1 }
   0xa   :  { %p443_p4 = pnand %p442_p3, %p436_p0 }
   0xc   :  { %446 = shalt.err (!%p443_p4)
}
   0xd   :  { %s508_s18 = smov 128   ;;  %s509_s19 = smov 8  }
   0xe   :  { %24 = dma.hbm_to_vmem [thread:$0]  %s566_s0, 256, %s19_s16, [#allocation3], %s508_s18, %s508_s18, %s509_s19  }
   0xf   :  { %s510_s22 = smov [#allocation6]  }
  0x10   :  { %s30_s23 = sshll.u32 %s510_s22, 4  ;;  %s31_s23 = int_to_ptr.vmem [resolvable:$true] %s30_s23 }
  0x11   :  { %s455_s24 = scalar_lea.vmem %s31_s23, 2048  ;;  %p460_p6 = scmp.lt.s32.totalorder %s31_s23, %s31_s23 }
  0x12   :  { %p456_p5 = scmp.ne.s32.totalorder %s31_s23, %s455_s24  ;;  %p461_p7 = scmp.lt.s32.totalorder %s455_s24, %s455_s24 }
  0x14   :  { %p462_p8 = por %p461_p7, %p460_p6 }
  0x16   :  { %p463_p9 = pnand %p462_p8, %p456_p5 }
  0x18   :  { %466 = shalt.err (!%p463_p9)
}
  0x19   :  { %s511_s25 = smov 64   ;;  %s512_s26 = smov 4  }
  0x1a   :  { %36 = dma.hbm_to_vmem [thread:$0]  %s567_s1, 2048, %s31_s23, [#allocation7], %s511_s25, %s511_s25, %s512_s26  }
  0x1b   :  { %s45_s0 = sshll.u32 %s569_s3, 4  ;;  %s46_s0 = int_to_ptr.vmem [resolvable:$true] %s45_s0 }
  0x1c   :  { %s467_s5 = scalar_lea.vmem %s46_s0, 16  ;;  %p472_p11 = scmp.lt.s32.totalorder %s46_s0, %s46_s0 }
  0x1d   :  { %p468_p10 = scmp.ne.s32.totalorder %s46_s0, %s467_s5  ;;  %p473_p12 = scmp.lt.s32.totalorder %s467_s5, %s467_s5 }
  0x1f   :  { %p474_p13 = por %p473_p12, %p472_p11 }
  0x21   :  { %p475_p0 = pnand %p474_p13, %p468_p10 }
  0x23   :  { %478 = shalt.err (!%p475_p0)
}
  0x24   :  { %s513_s6 = smov [#allocation8]  }
  0x25   :  { %48 = dma.vmem_to_smem %s46_s0, 16, %s513_s6, [#allocation5]  }
  0x26   :  { %499 = dma.done.wait [#allocation3], 256  }
  0x27   :  { %500 = vsyncadd [#allocation3], 4294967040 }
  0x28   :  { %501 = dma.done.wait [#allocation7], 2048  }
  0x29   :  { %502 = vsyncadd [#allocation7], 4294965248 }
  0x2a   :  { %503 = dma.done.wait [#allocation5], 16  }
  0x2b   :  { %504 = vsyncadd [#allocation5], 4294967280 }
  0x2c   :  { %58 = sfence }
  0x2d   :  { %v411_v0 = vld [vmem:[#allocation6 + $0x38] sm:$0xff]   ;;  %v514_v1 = vmov 0.0   ;;  %v412_v2 = vld [vmem:[#allocation6 + $0x30] sm:$0xff]   ;;  %vm515_vm0 = vmmov 0   ;;  %v413_v3 = vld [vmem:[#allocation6 + $0x28] sm:$0xff]   ;;  %s175_s1 = sld [smem:[#allocation8]] }
  0x2e   :  { %361 = vmatprep.subr.bf16.mxu0 %v514_v1  ;;  %381 = vmatprep.subr.bf16.mxu1 %v514_v1  ;;  %v419_v4 = vld [vmem:[#allocation6 + $0x78] sm:$0xff]   ;;  %v414_v5 = vld [vmem:[#allocation6 + $0x20] sm:$0xff]   ;;  %v420_v6 = vld [vmem:[#allocation6 + $0x70] sm:$0xff]   ;;  %s342_s8 = sld [smem:[#allocation8 + $0x1]]  ;;  %s516_s11 = smov [#allocation9]  }
  0x2f   :  { %362 = vmatpush3.bf16.msra.mxu0 %v411_v0  ;;  %377 = vmatprep.mubr.msk.bf16.mxu0 %vm515_vm0, %v514_v1  ;;  %v415_v7 = vld [vmem:[#allocation6 + $0x18] sm:$0xff]   ;;  %v421_v8 = vld [vmem:[#allocation6 + $0x68] sm:$0xff]   ;;  %v416_v9 = vld [vmem:[#allocation6 + $0x10] sm:$0xff]   ;;  %s310_s12 = sshll.u32 %s516_s11, 4  ;;  %s311_s12 = int_to_ptr.vmem [resolvable:$true] %s310_s12 }
  0x30   :  { %363 = vmatprep.subr.bf16.mxu0 %v514_v1  ;;  %397 = vmatprep.mubr.msk.bf16.mxu1 %vm515_vm0, %v514_v1  ;;  %v422_v10 = vld [vmem:[#allocation6 + $0x60] sm:$0xff]   ;;  %v417_v11 = vld [vmem:[#allocation6 + $0x8] sm:$0xff]   ;;  %v423_v12 = vld [vmem:[#allocation6 + $0x58] sm:$0xff]   ;;  %p484_p2 = scmp.lt.s32.totalorder %s311_s12, %s311_s12 }
  0x31   :  { %382 = vmatpush3.bf16.msra.mxu1 %v419_v4  ;;  %v418_v13 = vld [vmem:[#allocation6] sm:$0xff]   ;;  %v60_v14 = vld [vmem:[#allocation2] sm:$0xff]  ;;  %v61_v15 = vld [vmem:[#allocation2 + $0x8] sm:$0xff] }
  0x32   :  { %383 = vmatprep.subr.bf16.mxu1 %v514_v1  ;;  %v62_v16 = vpack.c.bf16 %v61_v15, %v60_v14  ;;  %v424_v17 = vld [vmem:[#allocation6 + $0x50] sm:$0xff]   ;;  %v425_v18 = vld [vmem:[#allocation6 + $0x48] sm:$0xff]   ;;  %v426_v19 = vld [vmem:[#allocation6 + $0x40] sm:$0xff]  }
  0x33   :  { %364 = vmatpush3.bf16.msra.mxu0 %v412_v2  ;;  %v324_v20 = vld [vmem:[%s568_s2] ss:$0 sm:$0xff]  ;;  %v176_v23 = vstv %s175_s1  ;;  %v333_v33 = vld [vmem:[%s568_s2 + $0x1] ss:$0 sm:$0xff]  ;;  %s479_s2 = scalar_lea.vmem %s311_s12, 256 }
  0x34   :  { %365 = vmatprep.subr.bf16.mxu0 %v514_v1  ;;  %v296_v35 = vstv %s342_s8  ;;  %p480_p1 = scmp.ne.s32.totalorder %s311_s12, %s479_s2  ;;  %p485_p3 = scmp.lt.s32.totalorder %s479_s2, %s479_s2 }
  0x35   :  { %384 = vmatpush3.bf16.msra.mxu1 %v420_v6 }
  0x36   :  { %385 = vmatprep.subr.bf16.mxu1 %v514_v1  ;;  %p486_p4 = por %p485_p3, %p484_p2 }
  0x37   :  { %366 = vmatpush3.bf16.msra.mxu0 %v413_v3 }
  0x38   :  { %367 = vmatprep.subr.bf16.mxu0 %v514_v1  ;;  %p487_p5 = pnand %p486_p4, %p480_p1 }
  0x39   :  { %386 = vmatpush3.bf16.msra.mxu1 %v421_v8 }
  0x3a   :  { %387 = vmatprep.subr.bf16.mxu1 %v514_v1 }
  0x3b   :  { %368 = vmatpush3.bf16.msra.mxu0 %v414_v5 }
  0x3c   :  { %369 = vmatprep.subr.bf16.mxu0 %v514_v1 }
  0x3d   :  { %388 = vmatpush3.bf16.msra.mxu1 %v422_v10 }
  0x3e   :  { %389 = vmatprep.subr.bf16.mxu1 %v514_v1 }
  0x3f   :  { %370 = vmatpush3.bf16.msra.mxu0 %v415_v7 }
  0x40   :  { %371 = vmatprep.subr.bf16.mxu0 %v514_v1 }
  0x41   :  { %390 = vmatpush3.bf16.msra.mxu1 %v423_v12 }
  0x42   :  { %391 = vmatprep.subr.bf16.mxu1 %v514_v1 }
  0x43   :  { %372 = vmatpush3.bf16.msra.mxu0 %v416_v9 }
  0x44   :  { %373 = vmatprep.subr.bf16.mxu0 %v514_v1 }
  0x45   :  { %392 = vmatpush3.bf16.msra.mxu1 %v424_v17 }
  0x46   :  { %393 = vmatprep.subr.bf16.mxu1 %v514_v1 }
  0x47   :  { %374 = vmatpush3.bf16.msra.mxu0 %v417_v11 }
  0x48   :  { %375 = vmatprep.subr.bf16.mxu0 %v514_v1 }
  0x49   :  { %394 = vmatpush3.bf16.msra.mxu1 %v425_v18 }
  0x4a   :  { %395 = vmatprep.subr.bf16.mxu1 %v514_v1 }
  0x4b   :  { %376 = vmatpush3.bf16.msra.mxu0 %v418_v13 }
  0x4d   :  { %396 = vmatpush3.bf16.msra.mxu1 %v426_v19 }
  0x4e   :  { %378 = vmatmul.mubr.bf16.vlgmr.msra.gmra.mxu0 %v62_v16 }
 0x10e   :  { %v166_v21 = vpop.f32.mrf.mxu0 }
 0x10f   :  { %v167_v22 = vadd.f32 %v324_v20, %v166_v21 }
 0x110   :  { %v379_v24 = vpop.f32.mrf.mxu0 }
 0x111   :  { %v177_v26 = vmul.f32 %v176_v23, %v167_v22  ;;  %vm173_vm1 = vcmp.gt.f32.partialorder %v167_v22, 0.0 }
 0x112   :  { %v169_v25 = vpop.f32.mrf.mxu0 }
 0x113   :  { %v170_v27 = vadd.f32 %v324_v20, %v169_v25  ;;  %v179_v30 = vsel %vm173_vm1, %v167_v22, %v177_v26 }
 0x114   :  { %v380_v28 = vpop.f32.mrf.mxu0 }
 0x115   :  { %vm174_vm2 = vcmp.gt.f32.partialorder %v170_v27, 0.0  ;;  %v178_v29 = vmul.f32 %v176_v23, %v170_v27 }
 0x117   :  { %v180_v31 = vsel %vm174_vm2, %v170_v27, %v178_v29 }
 0x118   :  { %v181_v32 = vpack.c.bf16 %v180_v31, %v179_v30 }
 0x11a   :  { %398 = vmatmul.mubr.bf16.vlgmr.msra.gmra.mxu1 %v181_v32 }
 0x1da   :  { %v286_v34 = vpop.f32.mrf.mxu1 }
 0x1db   :  { %v287_v36 = vadd.f32 %v333_v33, %v286_v34 }
 0x1dc   :  { %v399_v37 = vpop.f32.mrf.mxu1 }
 0x1dd   :  { %vm293_vm3 = vcmp.gt.f32.partialorder %v287_v36, 0.0  ;;  %v297_v38 = vmul.f32 %v296_v35, %v287_v36 }
 0x1de   :  { %v289_v39 = vpop.f32.mrf.mxu1 }
 0x1df   :  { %v290_v40 = vadd.f32 %v333_v33, %v289_v39  ;;  %v299_v41 = vsel %vm293_vm3, %v287_v36, %v297_v38 }
 0x1e0   :  { %v400_v42 = vpop.f32.mrf.mxu1  ;;  %v301_v43 = vadd.f32 %v299_v41, %v60_v14 }
 0x1e1   :  { %vm294_vm4 = vcmp.gt.f32.partialorder %v290_v40, 0.0  ;;  %v298_v44 = vmul.f32 %v296_v35, %v290_v40 }
 0x1e2   :  { %303 = vst [vmem:[#allocation9] sm:$0xff] %v301_v43 }
 0x1e3   :  { %v300_v45 = vsel %vm294_vm4, %v290_v40, %v298_v44 }
 0x1e4   :  { %v302_v46 = vadd.f32 %v300_v45, %v61_v15 }
 0x1e6   :  { %304 = vst [vmem:[#allocation9 + $0x8] sm:$0xff] %v302_v46 }
 0x1e7   :  { %490 = shalt.err (!%p487_p5)
}
 0x1e8   :  { %316 = dma.vmem_to_hbm [thread:$0]  %s311_s12, 256, %s570_s4, [#allocation4], %s508_s18, %s508_s18, %s509_s19  }
 0x1e9   :  { %505 = dma.done.wait [#allocation4], 256  }
 0x1ea   :  { %506 = vsyncadd [#allocation4], 4294967040 }
 0x1eb   :  { %320 = vsyncpa [#allocation3], 1 }
 0x1ec   :  { %321 = vsyncpa [#allocation7], 1 }
 0x1ed   :  { %322 = vsyncpa [#allocation4], 1 }
 0x1ee   :  { %323 = vsyncpa [#allocation5], 1 }

</bundles_post_ra>
